<compile_context>
chip_gen: v7x
topology: tpu7x:2x2x1
jax: 0.10.0
libtpu: 0.0.40
codegen_flags: <defaults>
</compile_context>

<pallas_src>
import functools

import jax
import jax.numpy as jnp
from jax.experimental import pallas as pl
from jax.experimental.pallas import tpu as pltpu

_MiB = 1024 * 1024


def _norm_kernel(x_ref, alpha_ref, bias_ref, o_ref, *, seq_len, eps):
    # x_ref:     (1, S, TILE_D) block for (batch b, d-tile d)
    # alpha_ref: (1, 1, TILE_D)
    # bias_ref:  (1, 1, TILE_D)
    x = x_ref[...]
    xf = x.astype(jnp.float32)

    # mean over dim=1 (sequence axis), f32 accumulation
    mean = jnp.mean(xf, axis=1, keepdims=True)                   # (1, 1, TD)
    diff = xf - mean                                             # (1, S, TD)

    # unbiased std over dim=1 (torch.std default: divide by N-1)
    var = jnp.sum(diff * diff, axis=1, keepdims=True) / jnp.float32(seq_len - 1)
    std = jnp.sqrt(var)                                          # (1, 1, TD)

    # Hoist the divide: reciprocal only over (1, 1, TILE_D), folded into the
    # alpha scale, so the (S, TILE_D) body is a single mul + add.  The exact
    # reciprocal keeps 1e-5 parity with the torch reference.
    inv = 1.0 / (std + jnp.float32(eps))                         # (1, 1, TD)
    scale = alpha_ref[...].astype(jnp.float32) * inv             # (1, 1, TD)

    if x.dtype == jnp.float32:
        out = diff * scale + bias_ref[...].astype(jnp.float32)
    else:
        # Low-precision inputs: stats stay in f32, elementwise tail runs in
        # the input dtype (free bf16 VALU slack on v6e/v7x; Mosaic upcasts
        # internally on v5e, so this is safe everywhere).
        out = (diff.astype(x.dtype) * scale.astype(x.dtype)
               + bias_ref[...].astype(x.dtype))
    o_ref[...] = out.astype(o_ref.dtype)


def _vmem_capacity_bytes():
    """Physical VMEM per TensorCore; conservative (v7x-sized) fallback."""
    try:
        cap = int(getattr(pltpu.get_tpu_info(), "vmem_capacity_bytes", 0))
        if cap > 0:
            return cap
    except Exception:
        pass
    return 64 * _MiB


def _choose_tile_d(seq_len, d_model, batch, bytes_per_elem,
                   stream_budget_bytes, min_steps=8):
    """Pick a lane-aligned D tile.

    Constraints:
      * TILE_D is a multiple of 128 that divides D exactly (or the full D
        when D is not a multiple of 128).
      * 4 double-buffered (1, S, TILE_D) slabs (x in + out, 2 buffers each)
        fit under `stream_budget_bytes`.
      * B * (D // TILE_D) >= min_steps when possible, so megacore sharding
        and the BlockSpec pipeline have enough grid steps.
    """
    if d_model % 128 != 0:
        # Mosaic needs the last block dim to be a multiple of 128 or the full
        # array extent -> take the whole axis.
        # TODO(synk): for D < 128 a lane-dense (S, B*D) re-layout would avoid
        # masked vst stores, but the wrapper transpose costs extra full HBM
        # passes on this mem-bound kernel, so it is intentionally not done.
        return d_model

    candidates = [t for t in range(128, d_model + 1, 128) if d_model % t == 0]
    fitting = [t for t in candidates
               if 4 * seq_len * t * bytes_per_elem <= stream_budget_bytes]
    if not fitting:
        # Even a single 128-wide column overflows the double-buffer budget
        # (very long S).  Caller falls back to single-buffered pipelining.
        return 128

    td = max(fitting)
    while batch * (d_model // td) < min_steps:
        smaller = [t for t in fitting if t < td]
        if not smaller:
            break
        td = max(smaller)
    return td


def norm_pallas(x, alpha, bias, eps=1e-6):
    """x: (B, S, D); alpha, bias: (D,).

    Reduction over dim=1 (S), unbiased std, eps added to std — exactly the
    torch module's forward.  NOTE: S == 1 divides by (S - 1) == 0 and yields
    NaN/Inf, matching torch.std's unbiased default.
    """
    B, S, D = x.shape
    itemsize = jnp.dtype(x.dtype).itemsize
    alpha3 = alpha.reshape(1, 1, D)
    bias3 = bias.reshape(1, 1, D)

    # Generation-aware VMEM budgets (v5e/v6e: 128 MiB, v7x: 64 MiB per TC).
    cap = _vmem_capacity_bytes()
    stream_budget = int(0.40 * cap)                   # x/out pipelined slabs
    vmem_limit = min(int(0.75 * cap), cap - 24 * _MiB)  # 96 MiB / 40 MiB

    tile_d = _choose_tile_d(S, D, B, itemsize, stream_budget)
    n_d = D // tile_d
    grid = (n_d, B)   # batch innermost: alpha/bias blocks stay resident

    double_buf_bytes = 4 * S * tile_d * itemsize
    single_buf_bytes = 2 * S * tile_d * itemsize
    needs_single_buffer = double_buf_bytes > stream_budget
    if needs_single_buffer and single_buf_bytes > vmem_limit - 4 * _MiB:
        # TODO(synk): S-tiled two-pass scheme (stats accumulated over an
        # 'arbitrary' S grid axis, then a normalize sweep) for extreme S.
        raise NotImplementedError(
            f"sequence length S={S} too long for a single VMEM column tile")

    spec_kwargs = {}
    if needs_single_buffer:
        spec_kwargs["pipeline_mode"] = pl.Buffered(1)

    x_spec = pl.BlockSpec((1, S, tile_d), lambda d, b: (b, 0, d), **spec_kwargs)
    o_spec = pl.BlockSpec((1, S, tile_d), lambda d, b: (b, 0, d), **spec_kwargs)
    p_spec = pl.BlockSpec((1, 1, tile_d), lambda d, b: (0, 0, d))

    kernel = functools.partial(_norm_kernel, seq_len=S, eps=eps)

    # Pure streaming kernel: ~5 flops/elem, x in + out of HBM, tiny params.
    cost = pl.CostEstimate(
        flops=5 * B * S * D,
        transcendentals=B * D,          # one sqrt per (b, d) column
        bytes_accessed=2 * B * S * D * itemsize
                       + 2 * D * jnp.dtype(alpha.dtype).itemsize,
    )

    return pl.pallas_call(
        kernel,
        out_shape=jax.ShapeDtypeStruct((B, S, D), x.dtype),
        grid_spec=pltpu.PrefetchScalarGridSpec(
            num_scalar_prefetch=0,
            grid=grid,
            in_specs=[x_spec, p_spec, p_spec],
            out_specs=o_spec,
        ),
        compiler_params=pltpu.CompilerParams(
            dimension_semantics=("parallel", "parallel"),
            vmem_limit_bytes=vmem_limit,
        ),
        cost_estimate=cost,
    )(x, alpha3, bias3)


def norm_reference(x, alpha, bias, eps=1e-6):
    """Pure-JAX reference matching the PyTorch forward exactly."""
    mean = jnp.mean(x, axis=1, keepdims=True)
    var = jnp.sum((x - mean) ** 2, axis=1, keepdims=True) / (x.shape[1] - 1)
    std = jnp.sqrt(var)
    return alpha * (x - mean) / (std + eps) + bias


if __name__ == "__main__":
    k1, k2 = jax.random.split(jax.random.PRNGKey(0))

    # Small shape matching the module (d_model = 32), D not a multiple of 128.
    B, S, D = 2, 8, 32
    x = jax.random.normal(k1, (B, S, D), dtype=jnp.float32)
    # Deterministic parameter init exactly as the module: ones for both.
    alpha = jnp.ones((D,), dtype=jnp.float32)
    bias = jnp.ones((D,), dtype=jnp.float32)

    out = jax.block_until_ready(norm_pallas(x, alpha, bias))
    ref = norm_reference(x, alpha, bias)
    assert out.shape == (B, S, D)
    assert jnp.allclose(out, ref, atol=1e-5, rtol=1e-5), "mismatch (D=32)"

    # Also exercise the lane-aligned, D-tiled path (D multiple of 128).
    D2 = 256
    x2 = jax.random.normal(k2, (B, S, D2), dtype=jnp.float32)
    alpha2 = jnp.ones((D2,), dtype=jnp.float32)
    bias2 = jnp.ones((D2,), dtype=jnp.float32)
    out2 = jax.block_until_ready(norm_pallas(x2, alpha2, bias2))
    ref2 = norm_reference(x2, alpha2, bias2)
    assert jnp.allclose(out2, ref2, atol=1e-5, rtol=1e-5), "mismatch (D=256)"

    print("KERNEL_OK")
</pallas_src>

<mosaic_0001>
module attributes {stable_mosaic.version = 11 : i64} {
  func.func @_norm_kernel(%arg0: i32, %arg1: i32, %arg2: memref<1x8x32xf32, #tpu.memory_space<vmem>>, %arg3: memref<1x1x32xf32, #tpu.memory_space<vmem>>, %arg4: memref<1x1x32xf32, #tpu.memory_space<vmem>>, %arg5: memref<1x8x32xf32, #tpu.memory_space<vmem>>) attributes {dimension_semantics = [#tpu.dimension_semantics<parallel>, #tpu.dimension_semantics<parallel>], iteration_bounds = array<i64: 1, 2>, scalar_prefetch = 0 : i64, scratch_operands = 0 : i64, tpu.core_type = #tpu.core_type<tc>, window_params = [{transform_indices = @transform_0, window_bounds = array<i64: 1, 8, 32>}, {transform_indices = @transform_1, window_bounds = array<i64: 1, 1, 32>}, {transform_indices = @transform_2, window_bounds = array<i64: 1, 1, 32>}, {transform_indices = @transform_3, window_bounds = array<i64: 1, 8, 32>}]} {
    %c0 = arith.constant 0 : index
    %c0_0 = arith.constant 0 : index
    %c0_1 = arith.constant 0 : index
    %0 = vector.load %arg2[%c0, %c0_0, %c0_1] : memref<1x8x32xf32, #tpu.memory_space<vmem>>, vector<1x8x32xf32>
    %cst = arith.constant dense<0.000000e+00> : vector<1x32xf32>
    %1 = vector.multi_reduction <add>, %0, %cst [1] : vector<1x8x32xf32> to vector<1x32xf32>
    %2 = vector.shape_cast %1 : vector<1x32xf32> to vector<1x1x32xf32>
    %cst_2 = arith.constant 8.000000e+00 : f32
    %3 = vector.broadcast %cst_2 : f32 to vector<1x1x32xf32>
    %4 = arith.divf %2, %3 : vector<1x1x32xf32>
    %5 = vector.broadcast %4 : vector<1x1x32xf32> to vector<1x8x32xf32>
    %6 = arith.subf %0, %5 : vector<1x8x32xf32>
    %7 = arith.mulf %6, %6 : vector<1x8x32xf32>
    %cst_3 = arith.constant dense<0.000000e+00> : vector<1x32xf32>
    %8 = vector.multi_reduction <add>, %7, %cst_3 [1] : vector<1x8x32xf32> to vector<1x32xf32>
    %9 = vector.shape_cast %8 : vector<1x32xf32> to vector<1x1x32xf32>
    %cst_4 = arith.constant 7.000000e+00 : f32
    %10 = vector.broadcast %cst_4 : f32 to vector<1x1x32xf32>
    %11 = arith.divf %9, %10 : vector<1x1x32xf32>
    %12 = math.sqrt %11 : vector<1x1x32xf32>
    %cst_5 = arith.constant 9.99999997E-7 : f32
    %13 = vector.broadcast %cst_5 : f32 to vector<1x1x32xf32>
    %14 = arith.addf %12, %13 : vector<1x1x32xf32>
    %cst_6 = arith.constant 1.000000e+00 : f32
    %15 = vector.broadcast %cst_6 : f32 to vector<1x1x32xf32>
    %16 = arith.divf %15, %14 : vector<1x1x32xf32>
    %c0_7 = arith.constant 0 : index
    %c0_8 = arith.constant 0 : index
    %c0_9 = arith.constant 0 : index
    %17 = vector.load %arg3[%c0_7, %c0_8, %c0_9] : memref<1x1x32xf32, #tpu.memory_space<vmem>>, vector<1x1x32xf32>
    %18 = arith.mulf %17, %16 : vector<1x1x32xf32>
    %19 = vector.broadcast %18 : vector<1x1x32xf32> to vector<1x8x32xf32>
    %20 = arith.mulf %6, %19 : vector<1x8x32xf32>
    %c0_10 = arith.constant 0 : index
    %c0_11 = arith.constant 0 : index
    %c0_12 = arith.constant 0 : index
    %21 = vector.load %arg4[%c0_10, %c0_11, %c0_12] : memref<1x1x32xf32, #tpu.memory_space<vmem>>, vector<1x1x32xf32>
    %22 = vector.broadcast %21 : vector<1x1x32xf32> to vector<1x8x32xf32>
    %23 = arith.addf %20, %22 : vector<1x8x32xf32>
    %c0_13 = arith.constant 0 : index
    %c0_14 = arith.constant 0 : index
    %c0_15 = arith.constant 0 : index
    %24 = vector.load %arg5[%c0_13, %c0_14, %c0_15] : memref<1x8x32xf32, #tpu.memory_space<vmem>>, vector<1x8x32xf32>
    tpu.vector_store %arg5[%c0_13, %c0_14, %c0_15], %23 {strides = array<i32>} : memref<1x8x32xf32, #tpu.memory_space<vmem>>, vector<1x8x32xf32>,
    return
  }
  func.func @transform_0(%arg0: i32, %arg1: i32) -> (i32, i32, i32) {
    %c0_i32 = arith.constant 0 : i32
    %c0_i32_0 = arith.constant 0 : i32
    return %arg1, %c0_i32, %arg0 : i32, i32, i32
  }
  func.func @transform_1(%arg0: i32, %arg1: i32) -> (i32, i32, i32) {
    %c0_i32 = arith.constant 0 : i32
    %c0_i32_0 = arith.constant 0 : i32
    %c0_i32_1 = arith.constant 0 : i32
    return %c0_i32, %c0_i32_0, %arg0 : i32, i32, i32
  }
  func.func @transform_2(%arg0: i32, %arg1: i32) -> (i32, i32, i32) {
    %c0_i32 = arith.constant 0 : i32
    %c0_i32_0 = arith.constant 0 : i32
    %c0_i32_1 = arith.constant 0 : i32
    return %c0_i32, %c0_i32_0, %arg0 : i32, i32, i32
  }
  func.func @transform_3(%arg0: i32, %arg1: i32) -> (i32, i32, i32) {
    %c0_i32 = arith.constant 0 : i32
    %c0_i32_0 = arith.constant 0 : i32
    return %arg1, %c0_i32, %arg0 : i32, i32, i32
  }
}

</mosaic_0001>

<bundles_post_ra>
// kernel: tpu_custom_call.1
= control target key start
LH: loop header
LB: loop body
LE: loop exit
PB: predicated region body
PF: predicated region fallthrough
CT: control target
= control target key end

     0   :  { %8 = vsyncpa [#allocation3], 0  ;;  %s803_s0 = inlined_call_operand.hbm [shape: f32[2,8,32], index: 0, kind: input, shape index: {}]   ;;  %s804_s1 = inlined_call_operand.vmem [shape: f32[1,1,32], index: 1, kind: input, shape index: {}]   ;;  %s805_s2 = inlined_call_operand.vmem [shape: f32[1,1,32], index: 2, kind: input, shape index: {}]   ;;  %s806_s3 = inlined_call_operand.hbm [shape: f32[2,8,32], index: 3, kind: output, shape index: {}]  }
   0x1   :  { %10 = vsyncpa [#allocation3 + $0x1], 0 }
   0x2   :  { %11 = vsyncpa [#allocation4], 0 }
   0x3   :  { %13 = vsyncpa [#allocation4 + $0x1], 0  ;;  %s618_s12 = smov 0   ;;  %s620_s13 = smov 0  }
   0x4   :  { %s622_s14 = smov 0   ;;  %s624_s15 = smov 0  }
   0x5   :  { %s626_s16 = smov 0   ;;  %s628_s17 = smov 0  }
   0x6 LB: > { %s400_s18 = sadd.s32 4294967295, %s594_s17   ;;  %s401_s19 = sadd.s32 4294967294, %s594_s17   ;;  %s594_s17 = sphi %s628_s17, %s19_s17   ;;  %s590_s16 = sphi %s626_s16, %s822_s16   ;;  %s586_s15 = sphi %s624_s15, %s821_s15   ;;  %s582_s14 = sphi %s622_s14, %s820_s14   ;;  %s578_s13 = sphi %s620_s13, %s819_s13   ;;  %s574_s12 = sphi %s618_s12, %s818_s12  }
   0x7   : > { %s28_s20 = sadd.s32 1, %s590_s16  ;;  %s40_s21 = sadd.s32 1, %s582_s14 }
   0x8   : > { %p29_p0 = scmp.ge.s32.totalorder %s28_s20, 2  ;;  %p47_p1 = scmp.ne.s32.totalorder %s582_s14, %s578_s13 }
   0x9   : > { %p48_p2 = scmp.eq.s32.totalorder %s594_s17, 0  ;;  %p53_p3 = scmp.ne.s32.totalorder %s578_s13, %s574_s12 }
   0xa   : > { %s824_s20 = smov (%p29_p0, %s28_s20), 0  ;;  %p54_p5 = scmp.eq.s32.totalorder %s400_s18, 0 }
   0xb   : > { %p659_p4 = por %p48_p2, %p47_p1  ;;  %s35_s23 = ssub.s32 %s590_s16, %s824_s20 }
   0xc   : > { %p131_p6 = scmp.eq.s32.totalorder %s400_s18, 1  ;;  %p38_p7 = scmp.eq.s32.totalorder %s35_s23, 0 }
   0xd   : > { %p665_p8 = por %p54_p5, %p53_p3  ;;  %p137_p10 = scmp.eq.s32.totalorder %s401_s19, 1 }
   0xe   : > { %p669_p9 = por %p131_p6, %p47_p1  ;;  %p428_p13 = scmp.lt.s32.totalorder %s594_s17, 2 }
   0xf   : > { %s674_s26 = scalar_select %p38_p7, %s582_s14, %s40_s21  }
  0x10   : > { %s810_s25 = scalar_select %p669_p9, 1, 0 }
  0x11   : > { %p676_p11 = por %p137_p10, %p53_p3  ;;  %s169_s28 = sand.u32 1, %s582_s14  }
  0x12   : > { %s406_s29 = sshll.u32 %s169_s28, 3  ;;  %s407_s30 = sshll.u32 %s590_s16, 7 }
  0x13   : > { %s811_s27 = scalar_select %p676_p11, 1, 0 }
  0x14   : > { %s687_s6 = scalar_lea.hbm %s803_s0, %s407_s30  ;;  %s173_s7 = scalar_lea.vmem [#allocation2], %s406_s29 }
  0x15   : > { %s181_s8 = sshll.u32 %s173_s7, 4  ;;  %p693_p0 = pnand %p428_p13, %p659_p4  ;;  %s689_s8 = int_to_ptr.vmem [resolvable:$true] %s181_s8 }
  0x16   : > { %s170_s10 = scalar_lea.sflag [#allocation3], %s169_s28  ;;  %s482_s11 = scalar_lea.hbm %s687_s6, 128 }
  0x17   : > { %p483_p3 = scmp.ne.s32.totalorder %s687_s6, %s482_s11  ;;  %p484_p5 = pneg %p693_p0 }
  0x18   : > { %s487_s21 = scalar_lea.hbm %s803_s0, 256  ;;  %p488_p4 = scmp.lt.u32.totalorder %s687_s6, %s803_s0 }
  0x19   : > { %p485_p6 = pnand %p484_p5, %p483_p3  ;;  %p489_p10 = scmp.lt.u32.totalorder %s487_s21, %s482_s11 }
  0x1a   : > { %p491_p12 = scmp.lt.u32.totalorder %s482_s11, %s687_s6 }
  0x1b   : > { %p486_p7 = pneg %p485_p6  ;;  %p490_p13 = por %p489_p10, %p488_p4 }
  0x1d   : > { %p492_p1 = por %p491_p12, %p490_p13 }
  0x1f   : > { %p493_p2 = pnand %p492_p1, %p486_p7 }
  0x21   : > { %496 = shalt.err (!%p493_p2)
}
  0x22   : > { %s497_s28 = scalar_lea.vmem %s689_s8, 128  ;;  %s596_s29 = smov [#allocation2]  }
  0x23   : > { %p498_p3 = scmp.ne.s32.totalorder %s689_s8, %s497_s28  ;;  %s502_s30 = sshll.u32 %s596_s29, 4  ;;  %s503_s30 = int_to_ptr.vmem [resolvable:$false] %s502_s30 }
  0x24   : > { %s504_s4 = scalar_lea.vmem %s503_s30, 256  ;;  %p505_p9 = scmp.lt.s32.totalorder %s689_s8, %s503_s30 }
  0x25   : > { %p500_p6 = pnand %p498_p3, %p484_p5  ;;  %p506_p4 = scmp.lt.s32.totalorder %s504_s4, %s497_s28 }
  0x27   : > { %p501_p11 = pneg %p500_p6  ;;  %p507_p10 = por %p506_p4, %p505_p9 }
  0x29   : > { %p508_p12 = pnand %p507_p10, %p501_p11 }
  0x2b   : > { %511 = shalt.err (!%p508_p12)
}
  0x2c   : > { %423 = dma.hbm_to_vmem [thread:$0]  (!%p693_p0), %s687_s6, 128, %s689_s8, %s170_s10  }
  0x2d   : > { %p813_p1 = scmp.lt.s32.totalorder %s594_s17, 3  ;;  %p814_p2 = scmp.ge.s32.totalorder %s594_s17, 1 }
  0x2f   : > { %p187_p5 = pnand %p814_p2, %p813_p1 }
  0x30   : > { %s729_s5 = sand.u32 (!%p187_p5), 1, %s578_s13  }
  0x31   : > { %190 = sbr.rel (%p187_p5) target bundleno = 142 (0x8e), region = 32  ;;  %s409_s7 = sshll.u32 (!%p187_p5), %s729_s5, 3 }
  0x32   : > { %s193_s11 = scalar_lea.sflag (!%p187_p5), [#allocation3], %s729_s5  ;;  %s196_s9 = scalar_lea.vmem (!%p187_p5), [#allocation2], %s409_s7 }
  0x38   : > { %565 = dma.done.wait (%p665_p8), %s193_s11, 128  }
  0x39   : > { %567 = vsyncadd (%p665_p8), %s193_s11, 4294967168  ;;  %vm232_vm0 = vcmask 261120   ;;  %v231_v0 = vld [vmem:[%s196_s9] sm:$0xff]  ;;  %v266_v25 = vlaneseq  ;;  %s224_s18 = scalar_lea.vmem [#allocation5], %s409_s7  ;;  %s413_s21 = sshll.u32 %s586_s15, 7 }
  0x3a   : > { %v233_v1 = vsel %vm232_vm0, %v231_v0, 0.0  ;;  %v263_v27 = vld [vmem:[%s804_s1] sm:$0x1]  ;;  %s296_s19 = sshll.u32 %s224_s18, 4  ;;  %s755_s28 = scalar_lea.hbm %s806_s3, %s413_s21  ;;  %s750_s19 = int_to_ptr.vmem [resolvable:$true] %s296_s19 }
  0x3b   : > { %v234_v2 = vrot.slane %v233_v1, 4  ;;  %v267_v26 = vshrl.u32 %v266_v25, 7  ;;  %v411_v32 = vld [vmem:[%s805_s2] ss:$0 sm:$0xff]  ;;  %s282_s29 = scalar_lea.sflag [#allocation4], %s729_s5  ;;  %s512_s30 = scalar_lea.vmem %s750_s19, 128 }
  0x3c   : > { %p513_p8 = scmp.ne.s32.totalorder %s750_s19, %s512_s30  ;;  %p815_p9 = scmp.ne.s32.totalorder %s810_s25, 0 }
  0x3d   : > { %v235_v3 = vadd.f32 %v234_v2, %v233_v1  ;;  %v268_v28 = vsub.s32 0, %v267_v26  ;;  %s597_s15 = smov [#allocation5]  }
  0x3e   : > { %p514_p11 = pnand %p513_p8, %p815_p9  ;;  %s516_s4 = sshll.u32 %s597_s15, 4  ;;  %s517_s4 = int_to_ptr.vmem [resolvable:$false] %s516_s4 }
  0x3f   : > { %v236_v4 = vrot.slane %v235_v3, 2  ;;  %s518_s7 = scalar_lea.vmem %s517_s4, 256  ;;  %p519_p7 = scmp.lt.s32.totalorder %s750_s19, %s517_s4 }
  0x40   : > { %p515_p0 = pneg %p514_p11  ;;  %p520_p13 = scmp.lt.s32.totalorder %s518_s7, %s512_s30 }
  0x41   : > { %v237_v5 = vadd.f32 %v236_v4, %v235_v3 }
  0x42   : > { %p521_p3 = por %p520_p13, %p519_p7 }
  0x43   : > { %v238_v6 = vrot.slane %v237_v5, 1 }
  0x44   : > { %p522_p6 = pnand %p521_p3, %p515_p0 }
  0x45   : > { %v239_v7 = vadd.f32 %v238_v6, %v237_v5 }
  0x47   : > { %v241_v8 = vmul.f32 0.125, %v239_v7 }
  0x49   : > { %v242_v9 = vsub.f32 %v231_v0, %v241_v8 }
  0x4b   : > { %v243_v10 = vmul.f32 %v242_v9, %v242_v9 }
  0x4d   : > { %v244_v11 = vsel %vm232_vm0, %v243_v10, 0.0 }
  0x4e   : > { %v245_v12 = vrot.slane %v244_v11, 4 }
  0x50   : > { %v246_v13 = vadd.f32 %v245_v12, %v244_v11 }
  0x52   : > { %v247_v14 = vrot.slane %v246_v13, 2 }
  0x54   : > { %v248_v15 = vadd.f32 %v247_v14, %v246_v13 }
  0x56   : > { %v249_v16 = vrot.slane %v248_v15, 1 }
  0x58   : > { %v250_v17 = vadd.f32 %v249_v16, %v248_v15 }
  0x5a   : > { %v252_v18 = vmul.f32 0.14285715, %v250_v17 }
  0x5c   : > { %478 = vrsqrt.f32 %v252_v18  ;;  %vm255_vm1 = vcmp.eq.f32.partialorder %v252_v18, inf  ;;  %v258_v20 = vand.u32 2147483648, %v252_v18  ;;  %vm257_vm2 = vcmp.eq.f32.partialorder %v252_v18, 0.0 }
  0x66   : > { %v479_v19 = vpop.eup %478 }
  0x67   : > { %v254_v21 = vmul.f32 %v479_v19, %v252_v18 }
  0x69   : > { %v256_v22 = vsel %vm255_vm1, %v252_v18, %v254_v21 }
  0x6a   : > { %v259_v23 = vsel %vm257_vm2, %v258_v20, %v256_v22 }
  0x6b   : > { %v260_v24 = vadd.f32 1e-06, %v259_v23 }
  0x6d   : > { %480 = vrcp.f32 %v260_v24 }
  0x77   : > { %v481_v29 = vpop.eup %480 }
  0x78   : > { %v264_v30 = vmul.f32 %v481_v29, %v263_v27 }
  0x7a   : > { %v269_v31 = vrot.slane %v264_v30, %v268_v28 }
  0x7c   : > { %v271_v33 = vmul.f32 %v269_v31, %v242_v9 }
  0x7e   : > { %v279_v34 = vadd.f32 %v411_v32, %v271_v33 }
  0x80   : > { %280 = vst.msk [vmem:[%s224_s18] sm:$0xff] %vm232_vm0, %v279_v34 }
  0x81   : > { %525 = shalt.err (!%p522_p6)
}
  0x82   : > { %s526_s5 = scalar_lea.hbm %s755_s28, 128  ;;  %s530_s24 = scalar_lea.hbm %s806_s3, 256 }
  0x83   : > { %p527_p4 = scmp.ne.s32.totalorder %s755_s28, %s526_s5  ;;  %p531_p1 = scmp.lt.u32.totalorder %s755_s28, %s806_s3 }
  0x84   : > { %p532_p2 = scmp.lt.u32.totalorder %s530_s24, %s526_s5  ;;  %p534_p8 = scmp.lt.u32.totalorder %s526_s5, %s755_s28 }
  0x85   : > { %p528_p10 = pnand %p527_p4, %p815_p9 }
  0x86   : > { %p533_p5 = por %p532_p2, %p531_p1 }
  0x87   : > { %p529_p12 = pneg %p528_p10 }
  0x88   : > { %p535_p11 = por %p534_p8, %p533_p5 }
  0x8a   : > { %p536_p0 = pnand %p535_p11, %p529_p12 }
  0x8c   : > { %539 = shalt.err (!%p536_p0)
}
  0x8d   : > { %418 = dma.vmem_to_hbm [thread:$0]  (%p815_p9), %s750_s19, 128, %s755_s28, %s282_s29  }
  0x8e PF: > { %s308_s10 = sand.u32 1, %s574_s12   ;;  %p816_p7 = scmp.ne.s32.totalorder %s811_s27, 0 }
  0x8f   : > { %p817_p13 = scmp.ge.s32.totalorder %s594_s17, 2  ;;  %s309_s18 = scalar_lea.sflag [#allocation4], %s308_s10 }
  0x91   : > { %p425_p3 = pnand %p817_p13, %p816_p7 }
  0x93   : > { %569 = dma.done.wait (!%p425_p3), %s309_s18, 128  }
  0x94   : > { %571 = vsyncadd (!%p425_p3), %s309_s18, 4294967168  ;;  %s19_s17 = sadd.s32 1, %s594_s17   ;;  %s818_s12 = smov %s578_s13 }
  0x95   : > { %p16_p6 = scmp.ge.s32.totalorder %s19_s17, 4   ;;  %s819_s13 = smov %s582_s14 }
  0x96   : > { %s820_s14 = smov %s674_s26  ;;  %s821_s15 = smov %s590_s16 }
  0x97   : > { %s822_s16 = smov %s824_s20  ;;  %18 = sbr.rel (!%p16_p6) target bundleno = 6 (0x6), region = 83 }
  0x9e   :  { %314 = vsyncpa [#allocation3], 1 }
  0x9f   :  { %316 = vsyncpa [#allocation3 + $0x1], 1 }
  0xa0   :  { %317 = vsyncpa [#allocation4], 1 }
  0xa1   :  { %319 = vsyncpa [#allocation4 + $0x1], 1 }

</bundles_post_ra>
